<compile_context>
chip_gen: v7x
topology: tpu7x:2x2x1
jax: 0.10.0
libtpu: 0.0.40
codegen_flags: <defaults>
</compile_context>

<pallas_src>
import functools

import jax
import jax.numpy as jnp
from jax.experimental import pallas as pl
from jax.experimental.pallas import tpu as pltpu


def _cdiv(a, b):
    return -(-a // b)


def _contrastive_loss_kernel(
    out_ref, lab_ref, loss_ref, acc_ref, *,
    margin, rows_total, cols_total, tile_rows, tile_cols,
    tiles_per_shard, full_row_tiles, need_row_mask, need_col_mask,
):
    c = pl.program_id(0)   # shard (parallel across TensorCores on v7x)
    i = pl.program_id(1)   # row tile within shard (reduction)
    j = pl.program_id(2)   # col tile              (reduction)
    ni = pl.num_programs(1)
    nj = pl.num_programs(2)

    @pl.when(jnp.logical_and(i == 0, j == 0))
    def _():
        acc_ref[...] = jnp.zeros_like(acc_ref)

    o = out_ref[...].astype(jnp.float32)
    l = lab_ref[...].astype(jnp.float32)
    hinge = jnp.maximum(margin - o, 0.0)
    o2 = o * o
    h2 = hinge * hinge
    # == l * o^2 + (1 - l) * h^2, one fewer multiply.
    per_elem = h2 + l * (o2 - h2)

    acc_rows = acc_ref.shape[0]

    def fold(x):
        # Collapse (tile_rows, tile_cols) onto the (acc_rows, tile_cols)
        # accumulator using only vreg-wise VPU adds (no XLU cross-lane work).
        if tile_rows == acc_rows:
            return x
        return x.reshape(tile_rows // acc_rows, acc_rows, tile_cols).sum(axis=0)

    global_row_tile = c * tiles_per_shard + i

    if need_row_mask or need_col_mask:
        # Only tail tiles (partial row/col tiles or shard-padding tiles) pay
        # the iota + compare + select cost; interior tiles take the cheap path.
        is_tail = None
        if need_row_mask:
            is_tail = global_row_tile >= full_row_tiles
        if need_col_mask:
            col_tail = j == nj - 1
            is_tail = col_tail if is_tail is None else jnp.logical_or(is_tail, col_tail)

        @pl.when(jnp.logical_not(is_tail))
        def _():
            acc_ref[...] += fold(per_elem)

        @pl.when(is_tail)
        def _():
            mask = None
            if need_row_mask:
                row = jax.lax.broadcasted_iota(jnp.int32, per_elem.shape, 0)
                mask = row < (rows_total - global_row_tile * tile_rows)
            if need_col_mask:
                col = jax.lax.broadcasted_iota(jnp.int32, per_elem.shape, 1)
                cmask = col < (cols_total - j * tile_cols)
                mask = cmask if mask is None else jnp.logical_and(mask, cmask)
            acc_ref[...] += fold(jnp.where(mask, per_elem, 0.0))
    else:
        acc_ref[...] += fold(per_elem)

    @pl.when(jnp.logical_and(i == ni - 1, j == nj - 1))
    def _():
        # Deferred cross-lane/sublane reduce + scalar store: once per shard.
        loss_ref[0, 0] = jnp.sum(acc_ref[...])


def _tpu_vmem_capacity_bytes():
    try:
        return int(pltpu.get_tpu_info().vmem_capacity_bytes)
    except Exception:
        return 64 << 20  # conservative (v7x-sized) fallback


def _choose_tiles(rows, cols, itemsize_out, itemsize_lab, step_bytes):
    """Pick (tile_rows, tile_cols).

    step_bytes budgets ONE (outputs + labels) tile pair; the BlockSpec pipeline
    double-buffers, so input VMEM use ~= 2 * step_bytes (+ small accumulator).
    """
    bpe = itemsize_out + itemsize_lab        # HBM bytes read per element
    min_rows = rows if rows < 8 else 8
    vmem_min_rows = 8                        # sublane padding floor in VMEM

    if min_rows * cols * bpe <= step_bytes or cols <= 128:
        # Full-width tiles; grow the row count toward the budget.
        tn = cols
        if rows <= 8:
            tb = rows
        else:
            tb = (step_bytes // max(1, cols * bpe)) // 8 * 8
            tb = max(8, min(tb, (rows // 8) * 8))
    else:
        # Very wide rows: tile the lane axis in multiples of 128.
        tb = min_rows
        tn = (step_bytes // max(1, vmem_min_rows * bpe)) // 128 * 128
        tn = max(128, min(tn, cols))
        if tn > cols:
            tn = cols
    return tb, tn


def contrastive_loss(outputs, labels, margin=1.0, *,
                     tile_rows=None, tile_cols=None, num_shards=2):
    """Pallas TPU implementation of ContrastiveLoss.forward (scalar mean loss).

    num_shards=2 splits the row reduction across a leading "parallel" grid
    axis so both v7x TensorCores are used; it degenerates gracefully on
    single-core chips and tiny inputs.
    """
    assert outputs.shape == labels.shape, (outputs.shape, labels.shape)
    n_elems = int(outputs.size)
    assert n_elems > 0

    # Canonicalize to 2-D (rows, cols); these reshapes are contiguous (free).
    if outputs.ndim == 2:
        o2d, l2d = outputs, labels
    elif outputs.ndim < 2:
        o2d = outputs.reshape(1, -1)
        l2d = labels.reshape(1, -1)
    else:
        o2d = outputs.reshape(-1, outputs.shape[-1])
        l2d = labels.reshape(-1, labels.shape[-1])
    R, C = o2d.shape

    itemsize_o = jnp.dtype(o2d.dtype).itemsize
    itemsize_l = jnp.dtype(l2d.dtype).itemsize

    # Per-generation VMEM budget: ~half of physical, capped at 48 MiB.
    vmem_cap = _tpu_vmem_capacity_bytes()
    vmem_budget = min(48 << 20, max(16 << 20, vmem_cap // 2))
    step_bytes = min(12 << 20, vmem_budget // 2)   # ~6 MiB per input tile

    tb, tn = _choose_tiles(R, C, itemsize_o, itemsize_l, step_bytes)
    if tile_rows is not None:
        tb = tile_rows
    if tile_cols is not None:
        tn = tile_cols

    n_row_tiles = _cdiv(R, tb)
    n_col_tiles = _cdiv(C, tn)
    shards = max(1, min(num_shards, n_row_tiles))
    tiles_per_shard = _cdiv(n_row_tiles, shards)
    padded_row_tiles = tiles_per_shard * shards

    full_row_tiles = R // tb
    need_row_mask = (R % tb != 0) or (padded_row_tiles != n_row_tiles)
    need_col_mask = (C % tn != 0)

    acc_rows = 8 if tb % 8 == 0 else tb

    kernel = functools.partial(
        _contrastive_loss_kernel,
        margin=float(margin),
        rows_total=R,
        cols_total=C,
        tile_rows=tb,
        tile_cols=tn,
        tiles_per_shard=tiles_per_shard,
        full_row_tiles=full_row_tiles,
        need_row_mask=need_row_mask,
        need_col_mask=need_col_mask,
    )

    if padded_row_tiles == n_row_tiles:
        def in_index_map(c, i, j):
            return (c * tiles_per_shard + i, j)
    else:
        max_row_block = n_row_tiles - 1

        def in_index_map(c, i, j):
            # Clamp shard-padding tiles in-bounds (no OOB DMA); the row mask
            # zeroes their contribution.
            return (jnp.minimum(c * tiles_per_shard + i, max_row_block), j)

    tile_pair_bytes = max(8, tb) * tn * (itemsize_o + itemsize_l)
    vmem_limit = int(min(vmem_cap * 3 // 4,
                         max(vmem_budget, 2 * tile_pair_bytes) + (16 << 20)))

    bytes_accessed = R * C * (itemsize_o + itemsize_l) + 4 * shards

    partials = pl.pallas_call(
        kernel,
        out_shape=jax.ShapeDtypeStruct((shards, 1), jnp.float32),
        grid_spec=pltpu.PrefetchScalarGridSpec(
            num_scalar_prefetch=0,
            grid=(shards, tiles_per_shard, n_col_tiles),
            in_specs=[
                pl.BlockSpec((tb, tn), in_index_map),
                pl.BlockSpec((tb, tn), in_index_map),
            ],
            out_specs=pl.BlockSpec(
                (1, 1), lambda c, i, j: (c, 0),
                memory_space=pltpu.MemorySpace.SMEM,
            ),
            scratch_shapes=[pltpu.VMEM((acc_rows, tn), jnp.float32)],
        ),
        compiler_params=pltpu.CompilerParams(
            # Shard axis may run on separate TensorCores (v7x); row/col axes
            # carry the accumulator so they are reductions.
            dimension_semantics=("parallel", "arbitrary", "arbitrary"),
            vmem_limit_bytes=vmem_limit,
        ),
        cost_estimate=pl.CostEstimate(
            flops=8 * n_elems, transcendentals=0, bytes_accessed=bytes_accessed
        ),
    )(o2d, l2d)

    return jnp.sum(partials) * (1.0 / float(n_elems))


def _reference(outputs, labels, margin=1.0):
    o = outputs.astype(jnp.float32)
    l = labels.astype(jnp.float32)
    loss = l * o ** 2 + (1.0 - l) * jnp.maximum(margin - o, 0.0) ** 2
    return jnp.mean(loss)


if __name__ == "__main__":
    key = jax.random.PRNGKey(0)
    k1, k2, k3, k4, k5, k6, k7 = jax.random.split(key, 7)
    margin = 1.0

    # Test 1: aligned 2-D shape, single-tile fast path (no masks, 1 shard).
    o1 = jax.random.uniform(k1, (8, 128), dtype=jnp.float32, minval=0.0, maxval=2.0)
    l1 = jax.random.bernoulli(k2, 0.5, (8, 128)).astype(jnp.float32)
    got1 = jax.block_until_ready(contrastive_loss(o1, l1, margin=margin))
    ref1 = _reference(o1, l1, margin)
    assert jnp.allclose(got1, ref1, rtol=1e-5, atol=1e-6), (got1, ref1)

    # Test 2: ragged batch + forced small tiles -> multi-step grid, 2-way shard
    # split with a padding tile, VMEM accumulator carry, row-tail masking.
    o2 = jax.random.uniform(k3, (20, 384), dtype=jnp.float32, minval=0.0, maxval=2.0)
    l2 = jax.random.bernoulli(k4, 0.5, (20, 384)).astype(jnp.float32)
    got2 = jax.block_until_ready(
        contrastive_loss(o2, l2, margin=margin, tile_rows=8, tile_cols=128))
    ref2 = _reference(o2, l2, margin)
    assert jnp.allclose(got2, ref2, rtol=1e-5, atol=1e-6), (got2, ref2)

    # Test 3: mixed dtypes (bf16 binary labels -> fewer HBM bytes) and a ragged
    # column axis -> column-tiling + column-tail masking path.
    o3 = jax.random.uniform(k5, (12, 200), dtype=jnp.float32, minval=0.0, maxval=2.0)
    l3 = jax.random.bernoulli(k6, 0.5, (12, 200)).astype(jnp.bfloat16)
    got3 = jax.block_until_ready(
        contrastive_loss(o3, l3, margin=margin, tile_rows=8, tile_cols=128))
    ref3 = _reference(o3, l3, margin)
    assert jnp.allclose(got3, ref3, rtol=1e-5, atol=1e-6), (got3, ref3)

    # Test 4: 1-D input (typical siamese distance vector shape).
    o4 = jax.random.uniform(k7, (37,), dtype=jnp.float32, minval=0.0, maxval=2.0)
    l4 = (jnp.arange(37) % 2).astype(jnp.float32)
    got4 = jax.block_until_ready(contrastive_loss(o4, l4, margin=margin))
    ref4 = _reference(o4, l4, margin)
    assert jnp.allclose(got4, ref4, rtol=1e-5, atol=1e-6), (got4, ref4)

    print("KERNEL_OK")
</pallas_src>

<mosaic_0001>
module attributes {stable_mosaic.version = 11 : i64} {
  func.func @_contrastive_loss_kernel(%arg0: i32, %arg1: i32, %arg2: i32, %arg3: memref<8x128xf32, #tpu.memory_space<vmem>>, %arg4: memref<8x128xf32, #tpu.memory_space<vmem>>, %arg5: memref<1x1xf32, #tpu.memory_space<smem>>, %arg6: memref<8x128xf32, #tpu.memory_space<vmem>>) attributes {dimension_semantics = [#tpu.dimension_semantics<parallel>, #tpu.dimension_semantics<arbitrary>, #tpu.dimension_semantics<arbitrary>], iteration_bounds = array<i64: 1, 1, 1>, scalar_prefetch = 0 : i64, scratch_operands = 1 : i64, tpu.core_type = #tpu.core_type<tc>, window_params = [{transform_indices = @transform_0, window_bounds = array<i64: 8, 128>}, {transform_indices = @transform_1, window_bounds = array<i64: 8, 128>}, {transform_indices = @transform_2, window_bounds = array<i64: 1, 1>}]} {
    %c0_i32 = arith.constant 0 : i32
    %0 = arith.cmpi eq, %arg1, %c0_i32 : i32
    %c0_i32_0 = arith.constant 0 : i32
    %1 = arith.cmpi eq, %arg2, %c0_i32_0 : i32
    %2 = arith.andi %0, %1 : i1
    %3 = arith.extui %2 : i1 to i32
    %c0_i32_1 = arith.constant 0 : i32
    %4 = arith.cmpi ne, %3, %c0_i32_1 : i32
    scf.if %4 {
      %cst_13 = arith.constant 0.000000e+00 : f32
      %24 = vector.broadcast %cst_13 : f32 to vector<8x128xf32>
      %c0_14 = arith.constant 0 : index
      %c0_15 = arith.constant 0 : index
      %25 = vector.load %arg6[%c0_14, %c0_15] : memref<8x128xf32, #tpu.memory_space<vmem>>, vector<8x128xf32>
      tpu.vector_store %arg6[%c0_14, %c0_15], %24 {strides = array<i32>} : memref<8x128xf32, #tpu.memory_space<vmem>>, vector<8x128xf32>,
    } else {
    }
    %c0 = arith.constant 0 : index
    %c0_2 = arith.constant 0 : index
    %5 = vector.load %arg3[%c0, %c0_2] : memref<8x128xf32, #tpu.memory_space<vmem>>, vector<8x128xf32>
    %c0_3 = arith.constant 0 : index
    %c0_4 = arith.constant 0 : index
    %6 = vector.load %arg4[%c0_3, %c0_4] : memref<8x128xf32, #tpu.memory_space<vmem>>, vector<8x128xf32>
    %cst = arith.constant 1.000000e+00 : f32
    %7 = vector.broadcast %cst : f32 to vector<8x128xf32>
    %8 = arith.subf %7, %5 : vector<8x128xf32>
    %cst_5 = arith.constant 0.000000e+00 : f32
    %9 = vector.broadcast %cst_5 : f32 to vector<8x128xf32>
    %10 = arith.maximumf %8, %9 : vector<8x128xf32>
    %11 = arith.mulf %5, %5 : vector<8x128xf32>
    %12 = arith.mulf %10, %10 : vector<8x128xf32>
    %13 = arith.subf %11, %12 : vector<8x128xf32>
    %14 = arith.mulf %6, %13 : vector<8x128xf32>
    %15 = arith.addf %12, %14 : vector<8x128xf32>
    %c0_6 = arith.constant 0 : index
    %c0_7 = arith.constant 0 : index
    %16 = vector.load %arg6[%c0_6, %c0_7] : memref<8x128xf32, #tpu.memory_space<vmem>>, vector<8x128xf32>
    %17 = arith.addf %16, %15 : vector<8x128xf32>
    %c0_8 = arith.constant 0 : index
    %c0_9 = arith.constant 0 : index
    %18 = vector.load %arg6[%c0_8, %c0_9] : memref<8x128xf32, #tpu.memory_space<vmem>>, vector<8x128xf32>
    tpu.vector_store %arg6[%c0_8, %c0_9], %17 {strides = array<i32>} : memref<8x128xf32, #tpu.memory_space<vmem>>, vector<8x128xf32>,
    %c0_i32_10 = arith.constant 0 : i32
    %19 = arith.cmpi eq, %arg1, %c0_i32_10 : i32
    %c0_i32_11 = arith.constant 0 : i32
    %20 = arith.cmpi eq, %arg2, %c0_i32_11 : i32
    %21 = arith.andi %19, %20 : i1
    %22 = arith.extui %21 : i1 to i32
    %c0_i32_12 = arith.constant 0 : i32
    %23 = arith.cmpi ne, %22, %c0_i32_12 : i32
    scf.if %23 {
      %c0_13 = arith.constant 0 : index
      %c0_14 = arith.constant 0 : index
      %24 = vector.load %arg6[%c0_13, %c0_14] : memref<8x128xf32, #tpu.memory_space<vmem>>, vector<8x128xf32>
      %25 = vector.shape_cast %24 : vector<8x128xf32> to vector<1x8x128xf32>
      %cst_15 = arith.constant dense<0.000000e+00> : vector<1xf32>
      %26 = vector.multi_reduction <add>, %25, %cst_15 [1, 2] : vector<1x8x128xf32> to vector<1xf32>
      %27 = vector.shape_cast %26 : vector<1xf32> to vector<1x1x1xf32>
      %28 = vector.extract %27[0, 0, 0] : f32 from vector<1x1x1xf32>
      %c0_16 = arith.constant 0 : index
      %c0_17 = arith.constant 0 : index
      %29 = memref.load %arg5[%c0_16, %c0_17] : memref<1x1xf32, #tpu.memory_space<smem>>
      memref.store %28, %arg5[%c0_16, %c0_17] : memref<1x1xf32, #tpu.memory_space<smem>>
    } else {
    }
    return
  }
  func.func @transform_0(%arg0: i32, %arg1: i32, %arg2: i32) -> (i32, i32) {
    %c1_i32 = arith.constant 1 : i32
    %0 = arith.muli %arg0, %c1_i32 : i32
    %1 = arith.addi %0, %arg1 : i32
    %c0_i32 = arith.constant 0 : i32
    return %1, %arg2 : i32, i32
  }
  func.func @transform_1(%arg0: i32, %arg1: i32, %arg2: i32) -> (i32, i32) {
    %c1_i32 = arith.constant 1 : i32
    %0 = arith.muli %arg0, %c1_i32 : i32
    %1 = arith.addi %0, %arg1 : i32
    %c0_i32 = arith.constant 0 : i32
    return %1, %arg2 : i32, i32
  }
  func.func @transform_2(%arg0: i32, %arg1: i32, %arg2: i32) -> (i32, i32) {
    %c0_i32 = arith.constant 0 : i32
    %c0_i32_0 = arith.constant 0 : i32
    return %arg0, %c0_i32 : i32, i32
  }
}

</mosaic_0001>

<bundles_post_ra>
// kernel: tpu_custom_call.1
= control target key start
LH: loop header
LB: loop body
LE: loop exit
PB: predicated region body
PF: predicated region fallthrough
CT: control target
= control target key end

     0   :  { %7 = vsyncpa [#allocation4], 0  ;;  %s211_s0 = inlined_call_operand.hbm [shape: f32[8,128], index: 0, kind: input, shape index: {}]   ;;  %s212_s1 = inlined_call_operand.hbm [shape: f32[8,128], index: 1, kind: input, shape index: {}]   ;;  %s213_s2 = inlined_call_operand.hbm [shape: f32[1,1], index: 2, kind: output, shape index: {}]  }
   0x1   :  { %8 = vsyncpa [#allocation7], 0 }
   0x2   :  { %9 = vsyncpa [#allocation5], 0  ;;  %s157_s9 = smov [#allocation3]   ;;  %s158_s11 = smov [#allocation6]  }
   0x3   :  { %s19_s10 = sshll.u32 %s157_s9, 4  ;;  %s32_s12 = sshll.u32 %s158_s11, 4  ;;  %s20_s10 = int_to_ptr.vmem [resolvable:$true] %s19_s10  ;;  %s33_s12 = int_to_ptr.vmem [resolvable:$true] %s32_s12 }
   0x4   :  { %s97_s15 = scalar_lea.hbm %s211_s0, 128 }
   0x5   :  { %p98_p0 = scmp.ne.s32.totalorder %s211_s0, %s97_s15  ;;  %p101_p1 = scmp.lt.u32.totalorder %s97_s15, %s211_s0 }
   0x7   :  { %p103_p2 = pnand %p101_p1, %p98_p0 }
   0x9   :  { %106 = shalt.err (!%p103_p2)
}
   0xa   :  { %s107_s20 = scalar_lea.vmem %s20_s10, 128  ;;  %p112_p4 = scmp.lt.s32.totalorder %s20_s10, %s20_s10 }
   0xb   :  { %p108_p3 = scmp.ne.s32.totalorder %s20_s10, %s107_s20  ;;  %p113_p5 = scmp.lt.s32.totalorder %s107_s20, %s107_s20 }
   0xd   :  { %p114_p6 = por %p113_p5, %p112_p4 }
   0xf   :  { %p115_p7 = pnand %p114_p6, %p108_p3 }
  0x11   :  { %118 = shalt.err (!%p115_p7)
}
  0x12   :  { %22 = dma.hbm_to_vmem [thread:$0]  %s211_s0, 128, %s20_s10, [#allocation4]  }
  0x13   :  { %s119_s25 = scalar_lea.hbm %s212_s1, 128 }
  0x14   :  { %p120_p8 = scmp.ne.s32.totalorder %s212_s1, %s119_s25  ;;  %p123_p9 = scmp.lt.u32.totalorder %s119_s25, %s212_s1 }
  0x16   :  { %p125_p10 = pnand %p123_p9, %p120_p8 }
  0x18   :  { %128 = shalt.err (!%p125_p10)
}
  0x19   :  { %s129_s30 = scalar_lea.vmem %s33_s12, 128  ;;  %p134_p12 = scmp.lt.s32.totalorder %s33_s12, %s33_s12 }
  0x1a   :  { %p130_p11 = scmp.ne.s32.totalorder %s33_s12, %s129_s30  ;;  %p135_p13 = scmp.lt.s32.totalorder %s129_s30, %s129_s30 }
  0x1c   :  { %p136_p0 = por %p135_p13, %p134_p12 }
  0x1e   :  { %p137_p1 = pnand %p136_p0, %p130_p11 }
  0x20   :  { %140 = shalt.err (!%p137_p1)
}
  0x21   :  { %35 = dma.hbm_to_vmem [thread:$0]  %s212_s1, 128, %s33_s12, [#allocation7]  }
  0x22   :  { %151 = dma.done.wait [#allocation4], 128  }
  0x23   :  { %152 = vsyncadd [#allocation4], 4294967168 }
  0x24   :  { %153 = dma.done.wait [#allocation7], 128  }
  0x25   :  { %154 = vsyncadd [#allocation7], 4294967168  ;;  %v51_v0 = vld [vmem:[#allocation3] sm:$0xff]  ;;  %v52_v5 = vld [vmem:[#allocation6] sm:$0xff]  ;;  %s141_s6 = scalar_lea.hbm %s213_s2, 16 }
  0x26   :  { %v53_v1 = vsub.f32 1.0, %v51_v0  ;;  %v55_v3 = vmul.f32 %v51_v0, %v51_v0  ;;  %p142_p2 = scmp.ne.s32.totalorder %s213_s2, %s141_s6  ;;  %p145_p3 = scmp.lt.u32.totalorder %s141_s6, %s213_s2 }
  0x28   :  { %v54_v2 = vmax.f32 %v53_v1, 0.0  ;;  %p147_p4 = pnand %p145_p3, %p142_p2 }
  0x2a   :  { %v56_v4 = vmul.f32 %v54_v2, %v54_v2 }
  0x2c   :  { %v57_v6 = vsub.f32 %v55_v3, %v56_v4 }
  0x2e   :  { %v58_v7 = vmul.f32 %v57_v6, %v52_v5 }
  0x30   :  { %v59_v8 = vadd.f32 %v58_v7, %v56_v4 }
  0x32   :  { %66 = vadd.xlane.f32.xlu0 %v59_v8 }
  0xbf   :  { %v67_v9 = vpop.xlane.xlu0 %66 }
  0xc0   :  { %v68_v10 = vrot.slane %v67_v9, 4 }
  0xc2   :  { %v69_v11 = vadd.f32 %v68_v10, %v67_v9 }
  0xc4   :  { %v70_v12 = vrot.slane %v69_v11, 2 }
  0xc6   :  { %v71_v13 = vadd.f32 %v70_v12, %v69_v11 }
  0xc8   :  { %v72_v14 = vrot.slane %v71_v13, 1 }
  0xca   :  { %v73_v15 = vadd.f32 %v72_v14, %v71_v13 }
  0xcc   :  { %92 = vpush %v73_v15 }
  0xfd   :  { %s93_s1 = spop %92 }
  0xfe   :  { %76 = sst [smem:[#allocation8]] %s93_s1 }
  0xff   :  { %150 = shalt.err (!%p147_p4)
}
 0x100   :  { %s159_s11 = smov [#allocation8]  }
 0x101   :  { %84 = dma.smem_to_hbm %s159_s11, 16, %s213_s2, [#allocation5]  }
 0x102   :  { %155 = dma.done.wait [#allocation5], 16  }
 0x103   :  { %156 = vsyncadd [#allocation5], 4294967280 }
 0x104   :  { %88 = sfence }
 0x105   :  { %89 = vsyncpa [#allocation4], 1 }
 0x106   :  { %90 = vsyncpa [#allocation7], 1 }
 0x107   :  { %91 = vsyncpa [#allocation5], 1 }

</bundles_post_ra>
